<compile_context>
chip_gen: v5e
topology: v5e:2x2
jax: 0.10.0
libtpu: 0.0.40
codegen_flags: <defaults>
</compile_context>

<pallas_src>
import functools
import math

import jax
import jax.numpy as jnp
from jax import lax
from jax.experimental import pallas as pl
from jax.experimental.pallas import tpu as pltpu


# ---------------------------------------------------------------------------
# Kernels
# ---------------------------------------------------------------------------

def _mha_kernel(q_ref, k_ref, v_ref, mask_ref,
                wq_ref, bq_ref, wk_ref, bk_ref, wv_ref, bv_ref,
                wo_ref, bo_ref, o_ref, *, heads, dk):
    """Fused multi-head attention for one batch element."""
    f32 = jnp.float32
    q = q_ref[0]        # (seq_q, d)
    k = k_ref[0]        # (seq_k, d)
    v = v_ref[0]        # (seq_k, d)
    mask = mask_ref[0]  # (seq_q, seq_k)

    qp = jnp.dot(q, wq_ref[...], preferred_element_type=f32) + bq_ref[...]
    kp = jnp.dot(k, wk_ref[...], preferred_element_type=f32) + bk_ref[...]
    vp = jnp.dot(v, wv_ref[...], preferred_element_type=f32) + bv_ref[...]

    inv_sqrt_dk = f32(1.0 / math.sqrt(dk))
    head_outs = []
    for h in range(heads):           # static unrolled loop over heads
        lo = h * dk
        qh = qp[:, lo:lo + dk]
        kh = kp[:, lo:lo + dk]
        vh = vp[:, lo:lo + dk]
        # q @ k^T without an explicit transpose.
        s = lax.dot_general(qh, kh, (((1,), (1,)), ((), ())),
                            preferred_element_type=f32) * inv_sqrt_dk
        s = jnp.where(mask == 0.0, f32(-1e10), s)
        m = jnp.max(s, axis=-1, keepdims=True)
        e = jnp.exp(s - m)
        denom = jnp.sum(e, axis=-1, keepdims=True)
        p = e * pl.reciprocal(denom, approx=True)   # EUP, not a VPU divide
        head_outs.append(jnp.dot(p, vh, preferred_element_type=f32))

    ctx = jnp.concatenate(head_outs, axis=-1)       # (seq_q, d)
    out = jnp.dot(ctx, wo_ref[...], preferred_element_type=f32) + bo_ref[...]
    o_ref[0] = out.astype(o_ref.dtype)


def _add_ln_kernel(a_ref, b_ref, gamma_ref, beta_ref, o_ref, *, eps):
    """out = LayerNorm(a + b) with the module's semantics:
       mean over last dim, unbiased std (ddof=1), eps added to the std."""
    x = a_ref[...] + b_ref[...]
    n = x.shape[-1]
    # Fused single pass: both reductions issued back-to-back on the same data.
    s1 = jnp.sum(x, axis=-1, keepdims=True)
    s2 = jnp.sum(x * x, axis=-1, keepdims=True)
    mean = s1 * (1.0 / n)
    var = jnp.maximum(s2 - s1 * mean, 0.0) * (1.0 / (n - 1))
    inv = pl.reciprocal(jnp.sqrt(var) + jnp.float32(eps), approx=True)
    out = gamma_ref[...] * (x - mean) * inv + beta_ref[...]
    o_ref[...] = out.astype(o_ref.dtype)


def _ffn_kernel(x_ref, w1_ref, b1_ref, w2_ref, b2_ref, o_ref):
    """Fused Linear -> ReLU -> Linear (dropout = identity)."""
    f32 = jnp.float32
    h = jnp.dot(x_ref[...], w1_ref[...], preferred_element_type=f32) + b1_ref[...]
    h = jnp.maximum(h, 0.0)
    y = jnp.dot(h, w2_ref[...], preferred_element_type=f32) + b2_ref[...]
    o_ref[...] = y.astype(o_ref.dtype)


def _linear_kernel(x_ref, w_ref, b_ref, o_ref):
    y = jnp.dot(x_ref[...], w_ref[...],
                preferred_element_type=jnp.float32) + b_ref[...]
    o_ref[...] = y.astype(o_ref.dtype)


# ---------------------------------------------------------------------------
# Pallas wrappers
# ---------------------------------------------------------------------------

def pallas_mha(q, k, v, mask, p, *, heads):
    batch, seq_q, d = q.shape
    seq_k = k.shape[1]
    dk = d // heads
    kernel = functools.partial(_mha_kernel, heads=heads, dk=dk)
    w_spec = pl.BlockSpec((d, d), lambda b: (0, 0))
    b_spec = pl.BlockSpec((1, d), lambda b: (0, 0))
    return pl.pallas_call(
        kernel,
        out_shape=jax.ShapeDtypeStruct((batch, seq_q, d), jnp.float32),
        grid=(batch,),
        in_specs=[
            pl.BlockSpec((1, seq_q, d), lambda b: (b, 0, 0)),
            pl.BlockSpec((1, seq_k, d), lambda b: (b, 0, 0)),
            pl.BlockSpec((1, seq_k, d), lambda b: (b, 0, 0)),
            pl.BlockSpec((1, seq_q, seq_k), lambda b: (b, 0, 0)),
            w_spec, b_spec, w_spec, b_spec, w_spec, b_spec, w_spec, b_spec,
        ],
        out_specs=pl.BlockSpec((1, seq_q, d), lambda b: (b, 0, 0)),
        compiler_params=pltpu.CompilerParams(
            dimension_semantics=("parallel",)),
    )(q, k, v, mask,
      p["wq"], p["bq"], p["wk"], p["bk"], p["wv"], p["bv"], p["wo"], p["bo"])


def pallas_add_layer_norm(a, b, ln, *, eps=1e-6):
    shape = a.shape
    d = shape[-1]
    a2 = a.reshape(-1, d)
    b2 = b.reshape(-1, d)
    out = pl.pallas_call(
        functools.partial(_add_ln_kernel, eps=eps),
        out_shape=jax.ShapeDtypeStruct(a2.shape, jnp.float32),
    )(a2, b2, ln["gamma"], ln["beta"])
    return out.reshape(shape)


def pallas_ffn(x, p):
    shape = x.shape
    d = shape[-1]
    x2 = x.reshape(-1, d)
    out = pl.pallas_call(
        _ffn_kernel,
        out_shape=jax.ShapeDtypeStruct(x2.shape, jnp.float32),
    )(x2, p["w1"], p["b1"], p["w2"], p["b2"])
    return out.reshape(shape)


def pallas_linear(x, w, b):
    shape = x.shape
    d = shape[-1]
    x2 = x.reshape(-1, d)
    out = pl.pallas_call(
        _linear_kernel,
        out_shape=jax.ShapeDtypeStruct((x2.shape[0], w.shape[1]), jnp.float32),
    )(x2, w, b)
    return out.reshape(shape[:-1] + (w.shape[1],))


# ---------------------------------------------------------------------------
# Model (forward pass, Pallas path)
# ---------------------------------------------------------------------------

def encoder_layer(x, x_mask, p, *, heads, eps):
    attn = pallas_mha(x, x, x, x_mask, p["mha"], heads=heads)
    h = pallas_add_layer_norm(attn, x, p["ln1"], eps=eps)
    ff = pallas_ffn(h, p["ffn"])
    h = pallas_add_layer_norm(ff, h, p["ln2"], eps=eps)
    return h


def decoder_layer(enc_out, tgt, x_mask, tgt_mask, p, *, heads, eps):
    a1 = pallas_mha(tgt, tgt, tgt, tgt_mask, p["mha1"], heads=heads)
    h = pallas_add_layer_norm(a1, tgt, p["ln1"], eps=eps)
    a2 = pallas_mha(h, enc_out, enc_out, x_mask, p["mha2"], heads=heads)
    h = pallas_add_layer_norm(a2, h, p["ln2"], eps=eps)
    ff = pallas_ffn(h, p["ffn"])
    h = pallas_add_layer_norm(ff, h, p["ln3"], eps=eps)
    return h


def transformer_forward(params, x_ids, x_mask, tgt_ids, tgt_mask,
                        *, heads, eps=1e-6):
    pe = params["pe"]
    # TODO(synk): embedding row-gather stays in plain JAX (no clean Pallas gather).
    emb_x = jnp.take(params["enc_emb"], x_ids, axis=0)
    # Module quirk: out = emb + PositionalEncoding(emb) = 2*emb + PE.
    h = 2.0 * emb_x + pe[: x_ids.shape[1]][None, :, :]
    for lp in params["enc_layers"]:
        h = encoder_layer(h, x_mask, lp, heads=heads, eps=eps)
    enc_out = h

    emb_t = jnp.take(params["dec_emb"], tgt_ids, axis=0)
    h = 2.0 * emb_t + pe[: tgt_ids.shape[1]][None, :, :]
    for lp in params["dec_layers"]:
        h = decoder_layer(enc_out, h, x_mask, tgt_mask, lp, heads=heads, eps=eps)

    return pallas_linear(h, params["out_w"], params["out_b"])


# ---------------------------------------------------------------------------
# Parameter init (deterministic) and positional encoding
# ---------------------------------------------------------------------------

def positional_encoding(sentence_len, d):
    pos = jnp.arange(sentence_len, dtype=jnp.float32)[:, None]
    i = jnp.arange(d // 2, dtype=jnp.float32)[None, :]
    denom = jnp.power(10000.0, 2.0 * i / d)
    angle = pos / denom
    pe = jnp.zeros((sentence_len, d), jnp.float32)
    pe = pe.at[:, 0::2].set(jnp.sin(angle))
    pe = pe.at[:, 1::2].set(jnp.cos(angle))
    return pe


def _init_linear(key, fan_in, fan_out):
    kw, kb = jax.random.split(key)
    bound = 1.0 / math.sqrt(fan_in)
    w = jax.random.uniform(kw, (fan_in, fan_out), jnp.float32, -bound, bound)
    b = jax.random.uniform(kb, (1, fan_out), jnp.float32, -bound, bound)
    return w, b


def _init_mha(key, d):
    ks = jax.random.split(key, 4)
    wq, bq = _init_linear(ks[0], d, d)
    wk, bk = _init_linear(ks[1], d, d)
    wv, bv = _init_linear(ks[2], d, d)
    wo, bo = _init_linear(ks[3], d, d)
    return dict(wq=wq, bq=bq, wk=wk, bk=bk, wv=wv, bv=bv, wo=wo, bo=bo)


def _init_ln(d):
    return dict(gamma=jnp.ones((1, d), jnp.float32),
                beta=jnp.zeros((1, d), jnp.float32))


def _init_ffn(key, d, inner):
    k1, k2 = jax.random.split(key)
    w1, b1 = _init_linear(k1, d, inner)
    w2, b2 = _init_linear(k2, inner, d)
    return dict(w1=w1, b1=b1, w2=w2, b2=b2)


def _init_encoder_layer(key, d, inner):
    k1, k2 = jax.random.split(key)
    return dict(mha=_init_mha(k1, d), ln1=_init_ln(d),
                ffn=_init_ffn(k2, d, inner), ln2=_init_ln(d))


def _init_decoder_layer(key, d, inner):
    k1, k2, k3 = jax.random.split(key, 3)
    return dict(mha1=_init_mha(k1, d), mha2=_init_mha(k2, d),
                ln1=_init_ln(d), ln2=_init_ln(d), ln3=_init_ln(d),
                ffn=_init_ffn(k3, d, inner))


def init_params(key, input_vocab, target_vocab, d, N, inner, max_len=128):
    keys = jax.random.split(key, 2 * N + 3)
    enc_layers = [_init_encoder_layer(keys[i], d, inner) for i in range(N)]
    dec_layers = [_init_decoder_layer(keys[N + i], d, inner) for i in range(N)]
    enc_emb = jax.random.normal(keys[2 * N], (input_vocab, d), jnp.float32)
    dec_emb = jax.random.normal(keys[2 * N + 1], (target_vocab, d), jnp.float32)
    out_w, out_b = _init_linear(keys[2 * N + 2], d, target_vocab)
    return dict(enc_emb=enc_emb, dec_emb=dec_emb,
                enc_layers=enc_layers, dec_layers=dec_layers,
                out_w=out_w, out_b=out_b, pe=positional_encoding(max_len, d))


# ---------------------------------------------------------------------------
# Pure-JAX reference (same math, exact division) for the correctness check
# ---------------------------------------------------------------------------

def _ref_ln(x, ln, eps):
    mean = jnp.mean(x, axis=-1, keepdims=True)
    dd = x - mean
    var = jnp.sum(dd * dd, axis=-1, keepdims=True) / (x.shape[-1] - 1)
    return ln["gamma"] * dd / (jnp.sqrt(var) + eps) + ln["beta"]


def _ref_mha(q, k, v, mask, p, heads):
    batch, sq, d = q.shape
    sk = k.shape[1]
    dk = d // heads
    qp = (q @ p["wq"] + p["bq"]).reshape(batch, sq, heads, dk).transpose(0, 2, 1, 3)
    kp = (k @ p["wk"] + p["bk"]).reshape(batch, sk, heads, dk).transpose(0, 2, 1, 3)
    vp = (v @ p["wv"] + p["bv"]).reshape(batch, sk, heads, dk).transpose(0, 2, 1, 3)
    s = jnp.einsum("bhqd,bhkd->bhqk", qp, kp) / math.sqrt(dk)
    s = jnp.where(mask[:, None, :, :] == 0.0, -1e10, s)
    a = jax.nn.softmax(s, axis=-1)
    ctx = jnp.einsum("bhqk,bhkd->bhqd", a, vp).transpose(0, 2, 1, 3)
    ctx = ctx.reshape(batch, sq, d)
    return ctx @ p["wo"] + p["bo"]


def _ref_ffn(x, p):
    return jnp.maximum(x @ p["w1"] + p["b1"], 0.0) @ p["w2"] + p["b2"]


def transformer_reference(params, x_ids, x_mask, tgt_ids, tgt_mask,
                          *, heads, eps=1e-6):
    pe = params["pe"]
    h = 2.0 * jnp.take(params["enc_emb"], x_ids, axis=0) + pe[: x_ids.shape[1]][None]
    for lp in params["enc_layers"]:
        a = _ref_mha(h, h, h, x_mask, lp["mha"], heads)
        h = _ref_ln(a + h, lp["ln1"], eps)
        f = _ref_ffn(h, lp["ffn"])
        h = _ref_ln(f + h, lp["ln2"], eps)
    enc_out = h
    h = 2.0 * jnp.take(params["dec_emb"], tgt_ids, axis=0) + pe[: tgt_ids.shape[1]][None]
    for lp in params["dec_layers"]:
        a1 = _ref_mha(h, h, h, tgt_mask, lp["mha1"], heads)
        h = _ref_ln(a1 + h, lp["ln1"], eps)
        a2 = _ref_mha(h, enc_out, enc_out, x_mask, lp["mha2"], heads)
        h = _ref_ln(a2 + h, lp["ln2"], eps)
        f = _ref_ffn(h, lp["ffn"])
        h = _ref_ln(f + h, lp["ln3"], eps)
    return h @ params["out_w"] + params["out_b"]


# ---------------------------------------------------------------------------
# Main
# ---------------------------------------------------------------------------

if __name__ == "__main__":
    input_vocab, target_vocab = 64, 128   # lane-dense final projection (128)
    batch, seq, heads, d, N = 2, 8, 4, 32, 2
    inner_dim = 2048                      # fixed in the FeedForward module
    eps = 1e-6

    key = jax.random.PRNGKey(0)
    k_params, k_x, k_t = jax.random.split(key, 3)
    params = init_params(k_params, input_vocab, target_vocab, d, N, inner_dim)

    x_ids = jax.random.randint(k_x, (batch, seq), 0, input_vocab)
    tgt_ids = jax.random.randint(k_t, (batch, seq), 0, target_vocab)
    x_mask = jnp.ones((batch, seq, seq), jnp.float32)
    tgt_mask = jnp.tile(jnp.tril(jnp.ones((seq, seq), jnp.float32))[None],
                        (batch, 1, 1))

    out = transformer_forward(params, x_ids, x_mask, tgt_ids, tgt_mask,
                              heads=heads, eps=eps)
    out = jax.block_until_ready(out)

    ref = transformer_reference(params, x_ids, x_mask, tgt_ids, tgt_mask,
                                heads=heads, eps=eps)

    assert out.shape == (batch, seq, target_vocab)
    max_err = float(jnp.max(jnp.abs(out - ref)))
    assert jnp.allclose(out, ref, atol=1e-2, rtol=1e-2), (
        f"mismatch vs reference, max abs err = {max_err}")

    print("KERNEL_OK")
</pallas_src>

<mosaic_0001>
module attributes {stable_mosaic.version = 11 : i64} {
  func.func @_mha_kernel(%arg0: i32, %arg1: memref<1x8x32xf32, #tpu.memory_space<vmem>>, %arg2: memref<1x8x32xf32, #tpu.memory_space<vmem>>, %arg3: memref<1x8x32xf32, #tpu.memory_space<vmem>>, %arg4: memref<1x8x8xf32, #tpu.memory_space<vmem>>, %arg5: memref<32x32xf32, #tpu.memory_space<vmem>>, %arg6: memref<1x32xf32, #tpu.memory_space<vmem>>, %arg7: memref<32x32xf32, #tpu.memory_space<vmem>>, %arg8: memref<1x32xf32, #tpu.memory_space<vmem>>, %arg9: memref<32x32xf32, #tpu.memory_space<vmem>>, %arg10: memref<1x32xf32, #tpu.memory_space<vmem>>, %arg11: memref<32x32xf32, #tpu.memory_space<vmem>>, %arg12: memref<1x32xf32, #tpu.memory_space<vmem>>, %arg13: memref<1x8x32xf32, #tpu.memory_space<vmem>>) attributes {dimension_semantics = [#tpu.dimension_semantics<parallel>], iteration_bounds = array<i64: 2>, scalar_prefetch = 0 : i64, scratch_operands = 0 : i64, tpu.core_type = #tpu.core_type<tc>, window_params = [{transform_indices = @transform_0, window_bounds = array<i64: 1, 8, 32>}, {transform_indices = @transform_1, window_bounds = array<i64: 1, 8, 32>}, {transform_indices = @transform_2, window_bounds = array<i64: 1, 8, 32>}, {transform_indices = @transform_3, window_bounds = array<i64: 1, 8, 8>}, {pipeline_mode = #tpu.pipeline_mode<synchronous>, transform_indices = @transform_4, window_bounds = array<i64: 32, 32>}, {pipeline_mode = #tpu.pipeline_mode<synchronous>, transform_indices = @transform_5, window_bounds = array<i64: 1, 32>}, {pipeline_mode = #tpu.pipeline_mode<synchronous>, transform_indices = @transform_6, window_bounds = array<i64: 32, 32>}, {pipeline_mode = #tpu.pipeline_mode<synchronous>, transform_indices = @transform_7, window_bounds = array<i64: 1, 32>}, {pipeline_mode = #tpu.pipeline_mode<synchronous>, transform_indices = @transform_8, window_bounds = array<i64: 32, 32>}, {pipeline_mode = #tpu.pipeline_mode<synchronous>, transform_indices = @transform_9, window_bounds = array<i64: 1, 32>}, {pipeline_mode = #tpu.pipeline_mode<synchronous>, transform_indices = @transform_10, window_bounds = array<i64: 32, 32>}, {pipeline_mode = #tpu.pipeline_mode<synchronous>, transform_indices = @transform_11, window_bounds = array<i64: 1, 32>}, {transform_indices = @transform_12, window_bounds = array<i64: 1, 8, 32>}]} {
    %c0 = arith.constant 0 : index
    %c0_0 = arith.constant 0 : index
    %c0_1 = arith.constant 0 : index
    %0 = vector.load %arg1[%c0, %c0_0, %c0_1] : memref<1x8x32xf32, #tpu.memory_space<vmem>>, vector<1x8x32xf32>
    %1 = vector.shape_cast %0 : vector<1x8x32xf32> to vector<8x32xf32>
    %c0_2 = arith.constant 0 : index
    %c0_3 = arith.constant 0 : index
    %c0_4 = arith.constant 0 : index
    %2 = vector.load %arg2[%c0_2, %c0_3, %c0_4] : memref<1x8x32xf32, #tpu.memory_space<vmem>>, vector<1x8x32xf32>
    %3 = vector.shape_cast %2 : vector<1x8x32xf32> to vector<8x32xf32>
    %c0_5 = arith.constant 0 : index
    %c0_6 = arith.constant 0 : index
    %c0_7 = arith.constant 0 : index
    %4 = vector.load %arg3[%c0_5, %c0_6, %c0_7] : memref<1x8x32xf32, #tpu.memory_space<vmem>>, vector<1x8x32xf32>
    %5 = vector.shape_cast %4 : vector<1x8x32xf32> to vector<8x32xf32>
    %c0_8 = arith.constant 0 : index
    %c0_9 = arith.constant 0 : index
    %c0_10 = arith.constant 0 : index
    %6 = vector.load %arg4[%c0_8, %c0_9, %c0_10] : memref<1x8x8xf32, #tpu.memory_space<vmem>>, vector<1x8x8xf32>
    %7 = vector.shape_cast %6 : vector<1x8x8xf32> to vector<8x8xf32>
    %c0_11 = arith.constant 0 : index
    %c0_12 = arith.constant 0 : index
    %8 = vector.load %arg5[%c0_11, %c0_12] : memref<32x32xf32, #tpu.memory_space<vmem>>, vector<32x32xf32>
    %cst = arith.constant dense<0.000000e+00> : vector<8x32xf32>
    %9 = tpu.matmul %1, %8, %cst {dimension_numbers = #tpu.dot_dimension_numbers<[1], [0], [0], [1], [0, 0, 1, 1], [], []>} : vector<8x32xf32>, vector<32x32xf32>, vector<8x32xf32> -> vector<8x32xf32>
    %c0_13 = arith.constant 0 : index
    %c0_14 = arith.constant 0 : index
    %10 = vector.load %arg6[%c0_13, %c0_14] : memref<1x32xf32, #tpu.memory_space<vmem>>, vector<1x32xf32>
    %11 = vector.broadcast %10 : vector<1x32xf32> to vector<8x32xf32>
    %12 = arith.addf %9, %11 : vector<8x32xf32>
    %c0_15 = arith.constant 0 : index
    %c0_16 = arith.constant 0 : index
    %13 = vector.load %arg7[%c0_15, %c0_16] : memref<32x32xf32, #tpu.memory_space<vmem>>, vector<32x32xf32>
    %cst_17 = arith.constant dense<0.000000e+00> : vector<8x32xf32>
    %14 = tpu.matmul %3, %13, %cst_17 {dimension_numbers = #tpu.dot_dimension_numbers<[1], [0], [0], [1], [0, 0, 1, 1], [], []>} : vector<8x32xf32>, vector<32x32xf32>, vector<8x32xf32> -> vector<8x32xf32>
    %c0_18 = arith.constant 0 : index
    %c0_19 = arith.constant 0 : index
    %15 = vector.load %arg8[%c0_18, %c0_19] : memref<1x32xf32, #tpu.memory_space<vmem>>, vector<1x32xf32>
    %16 = vector.broadcast %15 : vector<1x32xf32> to vector<8x32xf32>
    %17 = arith.addf %14, %16 : vector<8x32xf32>
    %c0_20 = arith.constant 0 : index
    %c0_21 = arith.constant 0 : index
    %18 = vector.load %arg9[%c0_20, %c0_21] : memref<32x32xf32, #tpu.memory_space<vmem>>, vector<32x32xf32>
    %cst_22 = arith.constant dense<0.000000e+00> : vector<8x32xf32>
    %19 = tpu.matmul %5, %18, %cst_22 {dimension_numbers = #tpu.dot_dimension_numbers<[1], [0], [0], [1], [0, 0, 1, 1], [], []>} : vector<8x32xf32>, vector<32x32xf32>, vector<8x32xf32> -> vector<8x32xf32>
    %c0_23 = arith.constant 0 : index
    %c0_24 = arith.constant 0 : index
    %20 = vector.load %arg10[%c0_23, %c0_24] : memref<1x32xf32, #tpu.memory_space<vmem>>, vector<1x32xf32>
    %21 = vector.broadcast %20 : vector<1x32xf32> to vector<8x32xf32>
    %22 = arith.addf %19, %21 : vector<8x32xf32>
    %23 = vector.extract_strided_slice %12 {offsets = [0, 0], sizes = [8, 8], strides = [1, 1]} : vector<8x32xf32> to vector<8x8xf32>
    %24 = vector.extract_strided_slice %17 {offsets = [0, 0], sizes = [8, 8], strides = [1, 1]} : vector<8x32xf32> to vector<8x8xf32>
    %25 = vector.extract_strided_slice %22 {offsets = [0, 0], sizes = [8, 8], strides = [1, 1]} : vector<8x32xf32> to vector<8x8xf32>
    %cst_25 = arith.constant dense<0.000000e+00> : vector<8x8xf32>
    %26 = tpu.matmul %23, %24, %cst_25 {dimension_numbers = #tpu.dot_dimension_numbers<[1], [1], [0], [0], [0, 0, 1, 0], [], []>} : vector<8x8xf32>, vector<8x8xf32>, vector<8x8xf32> -> vector<8x8xf32>
    %cst_26 = arith.constant 0.353553385 : f32
    %27 = vector.broadcast %cst_26 : f32 to vector<8x8xf32>
    %28 = arith.mulf %26, %27 : vector<8x8xf32>
    %cst_27 = arith.constant 0.000000e+00 : f32
    %29 = vector.broadcast %cst_27 : f32 to vector<8x8xf32>
    %30 = arith.cmpf oeq, %7, %29 : vector<8x8xf32>
    %cst_28 = arith.constant -1.000000e+10 : f32
    %31 = vector.broadcast %cst_28 : f32 to vector<8x8xf32>
    %32 = arith.select %30, %31, %28 : vector<8x8xi1>, vector<8x8xf32>
    %cst_29 = arith.constant dense<0xFF800000> : vector<8xf32>
    %33 = vector.multi_reduction <maximumf>, %32, %cst_29 [1] : vector<8x8xf32> to vector<8xf32>
    %34 = vector.shape_cast %33 : vector<8xf32> to vector<8x1xf32>
    %35 = vector.broadcast %34 : vector<8x1xf32> to vector<8x8xf32>
    %36 = arith.subf %32, %35 : vector<8x8xf32>
    %37 = math.exp %36 : vector<8x8xf32>
    %cst_30 = arith.constant dense<0.000000e+00> : vector<8xf32>
    %38 = vector.multi_reduction <add>, %37, %cst_30 [1] : vector<8x8xf32> to vector<8xf32>
    %39 = vector.shape_cast %38 : vector<8xf32> to vector<8x1xf32>
    %40 = tpu.reciprocal %39 {approx = true} : vector<8x1xf32> -> vector<8x1xf32>
    %41 = vector.broadcast %40 : vector<8x1xf32> to vector<8x8xf32>
    %42 = arith.mulf %37, %41 : vector<8x8xf32>
    %cst_31 = arith.constant dense<0.000000e+00> : vector<8x8xf32>
    %43 = tpu.matmul %42, %25, %cst_31 {dimension_numbers = #tpu.dot_dimension_numbers<[1], [0], [0], [1], [0, 0, 1, 1], [], []>} : vector<8x8xf32>, vector<8x8xf32>, vector<8x8xf32> -> vector<8x8xf32>
    %44 = vector.extract_strided_slice %12 {offsets = [0, 8], sizes = [8, 8], strides = [1, 1]} : vector<8x32xf32> to vector<8x8xf32>
    %45 = vector.extract_strided_slice %17 {offsets = [0, 8], sizes = [8, 8], strides = [1, 1]} : vector<8x32xf32> to vector<8x8xf32>
    %46 = vector.extract_strided_slice %22 {offsets = [0, 8], sizes = [8, 8], strides = [1, 1]} : vector<8x32xf32> to vector<8x8xf32>
    %cst_32 = arith.constant dense<0.000000e+00> : vector<8x8xf32>
    %47 = tpu.matmul %44, %45, %cst_32 {dimension_numbers = #tpu.dot_dimension_numbers<[1], [1], [0], [0], [0, 0, 1, 0], [], []>} : vector<8x8xf32>, vector<8x8xf32>, vector<8x8xf32> -> vector<8x8xf32>
    %cst_33 = arith.constant 0.353553385 : f32
    %48 = vector.broadcast %cst_33 : f32 to vector<8x8xf32>
    %49 = arith.mulf %47, %48 : vector<8x8xf32>
    %cst_34 = arith.constant 0.000000e+00 : f32
    %50 = vector.broadcast %cst_34 : f32 to vector<8x8xf32>
    %51 = arith.cmpf oeq, %7, %50 : vector<8x8xf32>
    %cst_35 = arith.constant -1.000000e+10 : f32
    %52 = vector.broadcast %cst_35 : f32 to vector<8x8xf32>
    %53 = arith.select %51, %52, %49 : vector<8x8xi1>, vector<8x8xf32>
    %cst_36 = arith.constant dense<0xFF800000> : vector<8xf32>
    %54 = vector.multi_reduction <maximumf>, %53, %cst_36 [1] : vector<8x8xf32> to vector<8xf32>
    %55 = vector.shape_cast %54 : vector<8xf32> to vector<8x1xf32>
    %56 = vector.broadcast %55 : vector<8x1xf32> to vector<8x8xf32>
    %57 = arith.subf %53, %56 : vector<8x8xf32>
    %58 = math.exp %57 : vector<8x8xf32>
    %cst_37 = arith.constant dense<0.000000e+00> : vector<8xf32>
    %59 = vector.multi_reduction <add>, %58, %cst_37 [1] : vector<8x8xf32> to vector<8xf32>
    %60 = vector.shape_cast %59 : vector<8xf32> to vector<8x1xf32>
    %61 = tpu.reciprocal %60 {approx = true} : vector<8x1xf32> -> vector<8x1xf32>
    %62 = vector.broadcast %61 : vector<8x1xf32> to vector<8x8xf32>
    %63 = arith.mulf %58, %62 : vector<8x8xf32>
    %cst_38 = arith.constant dense<0.000000e+00> : vector<8x8xf32>
    %64 = tpu.matmul %63, %46, %cst_38 {dimension_numbers = #tpu.dot_dimension_numbers<[1], [0], [0], [1], [0, 0, 1, 1], [], []>} : vector<8x8xf32>, vector<8x8xf32>, vector<8x8xf32> -> vector<8x8xf32>
    %65 = vector.extract_strided_slice %12 {offsets = [0, 16], sizes = [8, 8], strides = [1, 1]} : vector<8x32xf32> to vector<8x8xf32>
    %66 = vector.extract_strided_slice %17 {offsets = [0, 16], sizes = [8, 8], strides = [1, 1]} : vector<8x32xf32> to vector<8x8xf32>
    %67 = vector.extract_strided_slice %22 {offsets = [0, 16], sizes = [8, 8], strides = [1, 1]} : vector<8x32xf32> to vector<8x8xf32>
    %cst_39 = arith.constant dense<0.000000e+00> : vector<8x8xf32>
    %68 = tpu.matmul %65, %66, %cst_39 {dimension_numbers = #tpu.dot_dimension_numbers<[1], [1], [0], [0], [0, 0, 1, 0], [], []>} : vector<8x8xf32>, vector<8x8xf32>, vector<8x8xf32> -> vector<8x8xf32>
    %cst_40 = arith.constant 0.353553385 : f32
    %69 = vector.broadcast %cst_40 : f32 to vector<8x8xf32>
    %70 = arith.mulf %68, %69 : vector<8x8xf32>
    %cst_41 = arith.constant 0.000000e+00 : f32
    %71 = vector.broadcast %cst_41 : f32 to vector<8x8xf32>
    %72 = arith.cmpf oeq, %7, %71 : vector<8x8xf32>
    %cst_42 = arith.constant -1.000000e+10 : f32
    %73 = vector.broadcast %cst_42 : f32 to vector<8x8xf32>
    %74 = arith.select %72, %73, %70 : vector<8x8xi1>, vector<8x8xf32>
    %cst_43 = arith.constant dense<0xFF800000> : vector<8xf32>
    %75 = vector.multi_reduction <maximumf>, %74, %cst_43 [1] : vector<8x8xf32> to vector<8xf32>
    %76 = vector.shape_cast %75 : vector<8xf32> to vector<8x1xf32>
    %77 = vector.broadcast %76 : vector<8x1xf32> to vector<8x8xf32>
    %78 = arith.subf %74, %77 : vector<8x8xf32>
    %79 = math.exp %78 : vector<8x8xf32>
    %cst_44 = arith.constant dense<0.000000e+00> : vector<8xf32>
    %80 = vector.multi_reduction <add>, %79, %cst_44 [1] : vector<8x8xf32> to vector<8xf32>
    %81 = vector.shape_cast %80 : vector<8xf32> to vector<8x1xf32>
    %82 = tpu.reciprocal %81 {approx = true} : vector<8x1xf32> -> vector<8x1xf32>
    %83 = vector.broadcast %82 : vector<8x1xf32> to vector<8x8xf32>
    %84 = arith.mulf %79, %83 : vector<8x8xf32>
    %cst_45 = arith.constant dense<0.000000e+00> : vector<8x8xf32>
    %85 = tpu.matmul %84, %67, %cst_45 {dimension_numbers = #tpu.dot_dimension_numbers<[1], [0], [0], [1], [0, 0, 1, 1], [], []>} : vector<8x8xf32>, vector<8x8xf32>, vector<8x8xf32> -> vector<8x8xf32>
    %86 = vector.extract_strided_slice %12 {offsets = [0, 24], sizes = [8, 8], strides = [1, 1]} : vector<8x32xf32> to vector<8x8xf32>
    %87 = vector.extract_strided_slice %17 {offsets = [0, 24], sizes = [8, 8], strides = [1, 1]} : vector<8x32xf32> to vector<8x8xf32>
    %88 = vector.extract_strided_slice %22 {offsets = [0, 24], sizes = [8, 8], strides = [1, 1]} : vector<8x32xf32> to vector<8x8xf32>
    %cst_46 = arith.constant dense<0.000000e+00> : vector<8x8xf32>
    %89 = tpu.matmul %86, %87, %cst_46 {dimension_numbers = #tpu.dot_dimension_numbers<[1], [1], [0], [0], [0, 0, 1, 0], [], []>} : vector<8x8xf32>, vector<8x8xf32>, vector<8x8xf32> -> vector<8x8xf32>
    %cst_47 = arith.constant 0.353553385 : f32
    %90 = vector.broadcast %cst_47 : f32 to vector<8x8xf32>
    %91 = arith.mulf %89, %90 : vector<8x8xf32>
    %cst_48 = arith.constant 0.000000e+00 : f32
    %92 = vector.broadcast %cst_48 : f32 to vector<8x8xf32>
    %93 = arith.cmpf oeq, %7, %92 : vector<8x8xf32>
    %cst_49 = arith.constant -1.000000e+10 : f32
    %94 = vector.broadcast %cst_49 : f32 to vector<8x8xf32>
    %95 = arith.select %93, %94, %91 : vector<8x8xi1>, vector<8x8xf32>
    %cst_50 = arith.constant dense<0xFF800000> : vector<8xf32>
    %96 = vector.multi_reduction <maximumf>, %95, %cst_50 [1] : vector<8x8xf32> to vector<8xf32>
    %97 = vector.shape_cast %96 : vector<8xf32> to vector<8x1xf32>
    %98 = vector.broadcast %97 : vector<8x1xf32> to vector<8x8xf32>
    %99 = arith.subf %95, %98 : vector<8x8xf32>
    %100 = math.exp %99 : vector<8x8xf32>
    %cst_51 = arith.constant dense<0.000000e+00> : vector<8xf32>
    %101 = vector.multi_reduction <add>, %100, %cst_51 [1] : vector<8x8xf32> to vector<8xf32>
    %102 = vector.shape_cast %101 : vector<8xf32> to vector<8x1xf32>
    %103 = tpu.reciprocal %102 {approx = true} : vector<8x1xf32> -> vector<8x1xf32>
    %104 = vector.broadcast %103 : vector<8x1xf32> to vector<8x8xf32>
    %105 = arith.mulf %100, %104 : vector<8x8xf32>
    %cst_52 = arith.constant dense<0.000000e+00> : vector<8x8xf32>
    %106 = tpu.matmul %105, %88, %cst_52 {dimension_numbers = #tpu.dot_dimension_numbers<[1], [0], [0], [1], [0, 0, 1, 1], [], []>} : vector<8x8xf32>, vector<8x8xf32>, vector<8x8xf32> -> vector<8x8xf32>
    %107 = tpu.concatenate %43, %64, %85, %106 in 1 : vector<8x8xf32>, vector<8x8xf32>, vector<8x8xf32>, vector<8x8xf32> -> vector<8x32xf32>
    %c0_53 = arith.constant 0 : index
    %c0_54 = arith.constant 0 : index
    %108 = vector.load %arg11[%c0_53, %c0_54] : memref<32x32xf32, #tpu.memory_space<vmem>>, vector<32x32xf32>
    %cst_55 = arith.constant dense<0.000000e+00> : vector<8x32xf32>
    %109 = tpu.matmul %107, %108, %cst_55 {dimension_numbers = #tpu.dot_dimension_numbers<[1], [0], [0], [1], [0, 0, 1, 1], [], []>} : vector<8x32xf32>, vector<32x32xf32>, vector<8x32xf32> -> vector<8x32xf32>
    %c0_56 = arith.constant 0 : index
    %c0_57 = arith.constant 0 : index
    %110 = vector.load %arg12[%c0_56, %c0_57] : memref<1x32xf32, #tpu.memory_space<vmem>>, vector<1x32xf32>
    %111 = vector.broadcast %110 : vector<1x32xf32> to vector<8x32xf32>
    %112 = arith.addf %109, %111 : vector<8x32xf32>
    %c0_58 = arith.constant 0 : index
    %c0_59 = arith.constant 0 : index
    %c0_60 = arith.constant 0 : index
    %113 = vector.load %arg13[%c0_58, %c0_59, %c0_60] : memref<1x8x32xf32, #tpu.memory_space<vmem>>, vector<1x8x32xf32>
    %114 = vector.shape_cast %113 : vector<1x8x32xf32> to vector<8x32xf32>
    %115 = vector.shape_cast %112 : vector<8x32xf32> to vector<1x8x32xf32>
    tpu.vector_store %arg13[%c0_58, %c0_59, %c0_60], %115 {strides = array<i32>} : memref<1x8x32xf32, #tpu.memory_space<vmem>>, vector<1x8x32xf32>,
    return
  }
  func.func @transform_0(%arg0: i32) -> (i32, i32, i32) {
    %c0_i32 = arith.constant 0 : i32
    %c0_i32_0 = arith.constant 0 : i32
    %c0_i32_1 = arith.constant 0 : i32
    return %arg0, %c0_i32, %c0_i32_0 : i32, i32, i32
  }
  func.func @transform_1(%arg0: i32) -> (i32, i32, i32) {
    %c0_i32 = arith.constant 0 : i32
    %c0_i32_0 = arith.constant 0 : i32
    %c0_i32_1 = arith.constant 0 : i32
    return %arg0, %c0_i32, %c0_i32_0 : i32, i32, i32
  }
  func.func @transform_2(%arg0: i32) -> (i32, i32, i32) {
    %c0_i32 = arith.constant 0 : i32
    %c0_i32_0 = arith.constant 0 : i32
    %c0_i32_1 = arith.constant 0 : i32
    return %arg0, %c0_i32, %c0_i32_0 : i32, i32, i32
  }
  func.func @transform_3(%arg0: i32) -> (i32, i32, i32) {
    %c0_i32 = arith.constant 0 : i32
    %c0_i32_0 = arith.constant 0 : i32
    %c0_i32_1 = arith.constant 0 : i32
    return %arg0, %c0_i32, %c0_i32_0 : i32, i32, i32
  }
  func.func @transform_4(%arg0: i32) -> (i32, i32) {
    %c0_i32 = arith.constant 0 : i32
    %c0_i32_0 = arith.constant 0 : i32
    %c0_i32_1 = arith.constant 0 : i32
    return %c0_i32, %c0_i32_0 : i32, i32
  }
  func.func @transform_5(%arg0: i32) -> (i32, i32) {
    %c0_i32 = arith.constant 0 : i32
    %c0_i32_0 = arith.constant 0 : i32
    %c0_i32_1 = arith.constant 0 : i32
    return %c0_i32, %c0_i32_0 : i32, i32
  }
  func.func @transform_6(%arg0: i32) -> (i32, i32) {
    %c0_i32 = arith.constant 0 : i32
    %c0_i32_0 = arith.constant 0 : i32
    %c0_i32_1 = arith.constant 0 : i32
    return %c0_i32, %c0_i32_0 : i32, i32
  }
  func.func @transform_7(%arg0: i32) -> (i32, i32) {
    %c0_i32 = arith.constant 0 : i32
    %c0_i32_0 = arith.constant 0 : i32
    %c0_i32_1 = arith.constant 0 : i32
    return %c0_i32, %c0_i32_0 : i32, i32
  }
  func.func @transform_8(%arg0: i32) -> (i32, i32) {
    %c0_i32 = arith.constant 0 : i32
    %c0_i32_0 = arith.constant 0 : i32
    %c0_i32_1 = arith.constant 0 : i32
    return %c0_i32, %c0_i32_0 : i32, i32
  }
  func.func @transform_9(%arg0: i32) -> (i32, i32) {
    %c0_i32 = arith.constant 0 : i32
    %c0_i32_0 = arith.constant 0 : i32
    %c0_i32_1 = arith.constant 0 : i32
    return %c0_i32, %c0_i32_0 : i32, i32
  }
  func.func @transform_10(%arg0: i32) -> (i32, i32) {
    %c0_i32 = arith.constant 0 : i32
    %c0_i32_0 = arith.constant 0 : i32
    %c0_i32_1 = arith.constant 0 : i32
    return %c0_i32, %c0_i32_0 : i32, i32
  }
  func.func @transform_11(%arg0: i32) -> (i32, i32) {
    %c0_i32 = arith.constant 0 : i32
    %c0_i32_0 = arith.constant 0 : i32
    %c0_i32_1 = arith.constant 0 : i32
    return %c0_i32, %c0_i32_0 : i32, i32
  }
  func.func @transform_12(%arg0: i32) -> (i32, i32, i32) {
    %c0_i32 = arith.constant 0 : i32
    %c0_i32_0 = arith.constant 0 : i32
    %c0_i32_1 = arith.constant 0 : i32
    return %arg0, %c0_i32, %c0_i32_0 : i32, i32, i32
  }
}

</mosaic_0001>

<bundles_post_ra>
// kernel: tpu_custom_call.1
= control target key start
LH: loop header
LB: loop body
LE: loop exit
PB: predicated region body
PF: predicated region fallthrough
CT: control target
= control target key end

     0   :  { %s2116_s0 = inlined_call_operand.hbm [shape: f32[2,8,32], index: 0, kind: input, shape index: {}]   ;;  %s2117_s1 = inlined_call_operand.hbm [shape: f32[2,8,32], index: 1, kind: input, shape index: {}]   ;;  %s2118_s2 = inlined_call_operand.hbm [shape: f32[2,8,32], index: 2, kind: input, shape index: {}]   ;;  %s2119_s3 = inlined_call_operand.hbm [shape: f32[2,8,8], index: 3, kind: input, shape index: {}]   ;;  %s2120_s4 = inlined_call_operand.hbm [shape: f32[32,32], index: 4, kind: input, shape index: {}]   ;;  %s2121_s5 = inlined_call_operand.vmem [shape: f32[1,32], index: 5, kind: input, shape index: {}]   ;;  %s2122_s6 = inlined_call_operand.hbm [shape: f32[32,32], index: 6, kind: input, shape index: {}]   ;;  %s2123_s7 = inlined_call_operand.vmem [shape: f32[1,32], index: 7, kind: input, shape index: {}]   ;;  %s2124_s8 = inlined_call_operand.hbm [shape: f32[32,32], index: 8, kind: input, shape index: {}]   ;;  %s2125_s9 = inlined_call_operand.vmem [shape: f32[1,32], index: 9, kind: input, shape index: {}]   ;;  %s2126_s10 = inlined_call_operand.hbm [shape: f32[32,32], index: 10, kind: input, shape index: {}]   ;;  %s2127_s11 = inlined_call_operand.vmem [shape: f32[1,32], index: 11, kind: input, shape index: {}]   ;;  %s2128_s12 = inlined_call_operand.hbm [shape: f32[2,8,32], index: 12, kind: output, shape index: {}]  }
   0x1   :  { %2143 = sst [smem:[#allocation29_spill]] %s2117_s1 }
   0x2   :  { %2144 = sst [smem:[#allocation30_spill]] %s2120_s4 }
   0x3   :  { %2145 = sst [smem:[#allocation31_spill]] %s2122_s6 }
   0x4   :  { %2146 = sst [smem:[#allocation32_spill]] %s2124_s8 }
   0x5   :  { %2147 = sst [smem:[#allocation33_spill]] %s2126_s10 }
   0x6   :  { %2148 = sst [smem:[#allocation34_spill]] %s2127_s11 }
   0x7   :  { %2149 = sst [smem:[#allocation35_spill]] %s2128_s12 }
   0x8   :  { %17 = vsyncpa [#allocation3], 0 }
   0x9   :  { %19 = vsyncpa [#allocation3 + $0x1], 0 }
   0xa   :  { %20 = vsyncpa [#allocation6], 0 }
   0xb   :  { %22 = vsyncpa [#allocation6 + $0x1], 0 }
   0xc   :  { %23 = vsyncpa [#allocation9], 0 }
   0xd   :  { %25 = vsyncpa [#allocation9 + $0x1], 0 }
   0xe   :  { %26 = vsyncpa [#allocation12], 0 }
   0xf   :  { %27 = vsyncpa [#allocation15], 0 }
  0x10   :  { %28 = vsyncpa [#allocation4], 0 }
  0x11   :  { %30 = vsyncpa [#allocation4 + $0x1], 0  ;;  %s1794_s21 = smov 0   ;;  %s1796_s22 = smov 0  }
  0x12   :  { %s1798_s23 = smov 0   ;;  %s1800_s24 = smov 0  }
  0x13 LB: > { %2150 = sst [smem:[#allocation24_spill]] %s1703_s21  ;;  %s1815_s25 = sadd.s32 4294967295, %s1715_s24   ;;  %s1715_s24 = sphi %s1800_s24, %s2182_s24   ;;  %s1711_s23 = sphi %s1798_s23, %s2186_s23   ;;  %s1707_s22 = sphi %s1796_s22, %s2185_s22   ;;  %s1703_s21 = sphi %s1794_s21, %s2184_s21  }
  0x14   : > { %s1214_s26 = sadd.s32 4294967294, %s1715_s24   ;;  %p56_p0 = scmp.ne.s32.totalorder %s1707_s22, %s1703_s21 }
  0x15   : > { %p2140_p1 = scmp.eq.s32.totalorder %s1815_s25, 0  ;;  %p326_p2 = scmp.eq.s32.totalorder %s1815_s25, 1 }
  0x16   : > { %p332_p3 = scmp.eq.s32.totalorder %s1214_s26, 1  ;;  %p1215_p5 = scmp.ge.s32.totalorder %s1715_s24, 1 }
  0x17   : > { %p1824_p4 = por %p2140_p1, %p56_p0  ;;  %p339_p7 = scmp.lt.s32.totalorder %s1715_s24, 3 }
  0x18   : > { %p1829_p6 = por %p332_p3, %p56_p0  ;;  %s2154_s4 = sld [smem:[#allocation30_spill]] }
  0x19   : > { %p1837_p8 = pnand %p1215_p5, %p339_p7  ;;  %s1717_s15 = smov [#allocation10]  }
  0x1a   : > { %s2152_s28 = scalar_select %p1829_p6, 1, 0 }
  0x1b   : > { %p1285_p9 = pneg %p1837_p8  ;;  %s352_s16 = sshll.u32 %s1717_s15, 4  ;;  %s353_s16 = int_to_ptr.vmem [resolvable:$true] %s352_s16 }
  0x1c   : > { %2153 = sst [smem:[#allocation25_spill]] %s2152_s28  ;;  %s2129_s26 = smov 128  }
  0x1d   : > { %p1845_p10 = pnand %p1285_p9, %p2140_p1  ;;  %s2157_s6 = sld [smem:[#allocation31_spill]] }
  0x1e   : > { %s350_s13 = sshll.u32 %s2154_s4, 4  ;;  %s2131_s29 = smov 8   ;;  %s351_s13 = int_to_ptr.hbm [resolvable:$true] %s350_s13 }
  0x1f   : > { %1288 = dma.hbm_to_vmem [thread:$0]  (!%p1845_p10), %s351_s13, 512, %s353_s16, [#allocation9], %s2129_s26, %s2129_s26, %s2131_s29  }
  0x20   : > { %s1720_s30 = smov [#allocation11]   ;;  %s1864_s18 = sadd.s32 1, %s1715_s24  }
  0x21   : > { %s369_s15 = sshll.u32 %s1720_s30, 4  ;;  %2158 = sst [smem:[#allocation26_spill]] %s1864_s18  ;;  %s370_s15 = int_to_ptr.vmem [resolvable:$true] %s369_s15 }
  0x22   : > { %s43_s19 = sadd.s32 1, %s1711_s23  ;;  %s40_s4 = ssub.s32 %s1715_s24, %s1864_s18 }
  0x23   : > { %s367_s20 = sshll.u32 %s2157_s6, 4  ;;  %p50_p12 = scmp.ne.s32.totalorder %s1711_s23, %s1707_s22  ;;  %s368_s20 = int_to_ptr.hbm [resolvable:$true] %s367_s20 }
  0x24   : > { %1291 = dma.hbm_to_vmem [thread:$0]  (!%p1845_p10), %s368_s20, 512, %s370_s15, [#allocation12], %s2129_s26, %s2129_s26, %s2131_s29  }
  0x25   : > { %p41_p13 = scmp.eq.s32.totalorder %s40_s4, 0  ;;  %p51_p0 = scmp.eq.s32.totalorder %s1715_s24, 0 }
  0x26   : > { %p1874_p3 = por %p326_p2, %p50_p12  ;;  %p1319_p5 = scmp.lt.s32.totalorder %s1715_s24, 2 }
  0x27   : > { %s1880_s16 = scalar_select %p41_p13, %s1711_s23, %s43_s19  }
  0x28   : > { %s2159_s13 = scalar_select %p1874_p3, 1, 0 }
  0x29   : > { %2161 = sst [smem:[#allocation28_spill]] %s1880_s16  ;;  %p52_p7 = por %p51_p0, %p50_p12 }
  0x2a   : > { %2160 = sst [smem:[#allocation27_spill]] %s2159_s13  ;;  %s2136_s30 = sand.u32 1, %s1711_s23  }
  0x2b   : > { %s1885_s20 = sshll.u32 %s2136_s30, 3  ;;  %s1888_s15 = sshll.u32 %s1715_s24, 3 }
  0x2c   : > { %p1890_p9 = pnand %p1319_p5, %p52_p7  ;;  %s2141_s26 = sand.u32 1, %s1715_s24  }
  0x2d   : > { %s2163_s1 = sld [smem:[#allocation29_spill]]  ;;  %s443_s18 = scalar_lea.vmem [#allocation5], %s1885_s20 }
  0x2e   : > { %s451_s28 = sshll.u32 %s443_s18, 4  ;;  %s1902_s30 = scalar_lea.sflag [#allocation6], %s2141_s26  ;;  %s452_s28 = int_to_ptr.vmem [resolvable:$true] %s451_s28 }
  0x2f   : > { %p1453_p12 = pneg %p1890_p9 }
  0x33   : > { %s447_s19 = scalar_lea.hbm %s2163_s1, %s1888_s15 }
  0x34   : > { %s449_s16 = sshll.u32 %s447_s19, 4  ;;  %s1456_s19 = scalar_lea.hbm %s2163_s1, 16  ;;  %s450_s16 = int_to_ptr.hbm [resolvable:$true] %s449_s16 }
  0x35   : > { %s1449_s21 = sshra.s32 %s450_s16, 4  ;;  %s1450_s21 = int_to_ptr.hbm [resolvable:$true] %s1449_s21 }
  0x36   : > { %s1451_s11 = scalar_lea.hbm %s1450_s21, 8  ;;  %p1457_p5 = scmp.lt.s32.totalorder %s1450_s21, %s2163_s1 }
  0x37   : > { %p1452_p2 = scmp.ne.s32.totalorder %s1450_s21, %s1451_s11  ;;  %p1458_p7 = scmp.lt.s32.totalorder %s1456_s19, %s1451_s11 }
  0x39   : > { %p1454_p13 = pnand %p1453_p12, %p1452_p2  ;;  %p1459_p11 = por %p1458_p7, %p1457_p5 }
  0x3b   : > { %p1455_p0 = pneg %p1454_p13 }
  0x3d   : > { %p1460_p1 = pnand %p1459_p11, %p1455_p0 }
  0x3f   : > { %1463 = shalt.err (!%p1460_p1)
}
  0x40   : > { %1304 = dma.hbm_to_vmem [thread:$0]  (!%p1890_p9), %s450_s16, 128, %s452_s28, %s1902_s30  }
  0x41   : > { %s2164_s8 = sld [smem:[#allocation32_spill]]  ;;  %s1721_s29 = smov [#allocation13]  }
  0x42   : > { %s386_s21 = sshll.u32 %s1721_s29, 4  ;;  %s2165_s10 = sld [smem:[#allocation33_spill]]  ;;  %s387_s21 = int_to_ptr.vmem [resolvable:$true] %s386_s21 }
  0x43   : > { %s2166_s18 = smov 8   ;;  %s2167_s1 = smov 128  }
  0x44   : > { %s1722_s28 = smov [#allocation14]   ;;  %s424_s11 = scalar_lea.vmem [#allocation2], %s1885_s20 }
  0x45   : > { %s403_s16 = sshll.u32 %s1722_s28, 4  ;;  %s432_s13 = sshll.u32 %s424_s11, 4  ;;  %s404_s16 = int_to_ptr.vmem [resolvable:$true] %s403_s16  ;;  %s433_s13 = int_to_ptr.vmem [resolvable:$true] %s432_s13 }
  0x46   : > { %s1546_s26 = scalar_lea.hbm %s2116_s0, 16 }
  0x47   : > { %s384_s6 = sshll.u32 %s2164_s8, 4  ;;  %s428_s8 = scalar_lea.hbm %s2116_s0, %s1888_s15  ;;  %s385_s6 = int_to_ptr.hbm [resolvable:$true] %s384_s6 }
  0x48   : > { %s401_s19 = sshll.u32 %s2165_s10, 4  ;;  %s430_s29 = sshll.u32 %s428_s8, 4  ;;  %s402_s19 = int_to_ptr.hbm [resolvable:$true] %s401_s19  ;;  %s431_s29 = int_to_ptr.hbm [resolvable:$true] %s430_s29 }
  0x49   : > { %1294 = dma.hbm_to_vmem [thread:$0]  (!%p1845_p10), %s385_s6, 512, %s387_s21, [#allocation12], %s2167_s1, %s2167_s1, %s2166_s18  }
  0x4a   : > { %1297 = dma.hbm_to_vmem [thread:$0]  (!%p1845_p10), %s402_s19, 512, %s404_s16, [#allocation15], %s2167_s1, %s2167_s1, %s2166_s18  }
  0x4b   : > { %s2168_s10 = sand.u32 1, %s1711_s23   ;;  %s1539_s21 = sshra.s32 %s431_s29, 4  ;;  %s1540_s21 = int_to_ptr.hbm [resolvable:$true] %s1539_s21 }
  0x4c   : > { %s421_s6 = scalar_lea.sflag [#allocation3], %s2168_s10  ;;  %s1541_s28 = scalar_lea.hbm %s1540_s21, 8 }
  0x4d   : > { %p1542_p1 = scmp.ne.s32.totalorder %s1540_s21, %s1541_s28  ;;  %p1547_p10 = scmp.lt.s32.totalorder %s1540_s21, %s2116_s0 }
  0x4e   : > { %p1548_p13 = scmp.lt.s32.totalorder %s1546_s26, %s1541_s28 }
  0x4f   : > { %p1544_p11 = pnand %p1542_p1, %p1453_p12 }
  0x50   : > { %p1549_p0 = por %p1548_p13, %p1547_p10 }
  0x51   : > { %p1545_p2 = pneg %p1544_p11 }
  0x53   : > { %p1550_p5 = pnand %p1549_p0, %p1545_p2 }
  0x55   : > { %1553 = shalt.err (!%p1550_p5)
}
  0x56   : > { %1301 = dma.hbm_to_vmem [thread:$0]  (!%p1890_p9), %s431_s29, 128, %s433_s13, %s421_s6  }
  0x57   : > { %s466_s18 = scalar_lea.hbm %s2118_s2, %s1888_s15  ;;  %s462_s11 = scalar_lea.vmem [#allocation7], %s1885_s20 }
  0x58   : > { %s468_s16 = sshll.u32 %s466_s18, 4  ;;  %s470_s17 = sshll.u32 %s462_s11, 4  ;;  %s469_s16 = int_to_ptr.hbm [resolvable:$true] %s468_s16  ;;  %s471_s17 = int_to_ptr.vmem [resolvable:$true] %s470_s17 }
  0x59   : > { %s1569_s21 = sshra.s32 %s469_s16, 4  ;;  %s1576_s29 = scalar_lea.hbm %s2118_s2, 16  ;;  %s1570_s21 = int_to_ptr.hbm [resolvable:$true] %s1569_s21 }
  0x5a   : > { %s1571_s28 = scalar_lea.hbm %s1570_s21, 8  ;;  %p1577_p2 = scmp.lt.s32.totalorder %s1570_s21, %s2118_s2 }
  0x5b   : > { %p1572_p7 = scmp.ne.s32.totalorder %s1570_s21, %s1571_s28  ;;  %p1578_p10 = scmp.lt.s32.totalorder %s1576_s29, %s1571_s28 }
  0x5d   : > { %p1574_p1 = pnand %p1572_p7, %p1453_p12  ;;  %p1579_p13 = por %p1578_p10, %p1577_p2 }
  0x5f   : > { %p1575_p11 = pneg %p1574_p1 }
  0x61   : > { %p1580_p0 = pnand %p1579_p13, %p1575_p11 }
  0x63   : > { %1583 = shalt.err (!%p1580_p0)
}
  0x64   : > { %1307 = dma.hbm_to_vmem [thread:$0]  (!%p1890_p9), %s469_s16, 128, %s471_s17, %s1902_s30  }
  0x65   : > { %s485_s10 = scalar_lea.hbm %s2119_s3, %s1888_s15  ;;  %s481_s18 = scalar_lea.vmem [#allocation8], %s1885_s20 }
  0x66   : > { %s487_s19 = sshll.u32 %s485_s10, 4  ;;  %s489_s11 = sshll.u32 %s481_s18, 4  ;;  %s488_s19 = int_to_ptr.hbm [resolvable:$true] %s487_s19  ;;  %s490_s11 = int_to_ptr.vmem [resolvable:$true] %s489_s11 }
  0x67   : > { %s2169_s21 = sand.u32 1, %s1715_s24   ;;  %s1599_s12 = sshra.s32 %s488_s19, 4  ;;  %s1600_s12 = int_to_ptr.hbm [resolvable:$true] %s1599_s12 }
  0x68   : > { %s478_s28 = scalar_lea.sflag [#allocation9], %s2169_s21  ;;  %s1601_s26 = scalar_lea.hbm %s1600_s12, 8 }
  0x69   : > { %p1602_p5 = scmp.ne.s32.totalorder %s1600_s12, %s1601_s26  ;;  %s1606_s17 = scalar_lea.hbm %s2119_s3, 16 }
  0x6a   : > { %p1607_p11 = scmp.lt.s32.totalorder %s1600_s12, %s2119_s3  ;;  %p1608_p2 = scmp.lt.s32.totalorder %s1606_s17, %s1601_s26 }
  0x6b   : > { %p1604_p7 = pnand %p1602_p5, %p1453_p12 }
  0x6c   : > { %p1609_p10 = por %p1608_p2, %p1607_p11 }
  0x6d   : > { %p1605_p1 = pneg %p1604_p7 }
  0x6f   : > { %p1610_p13 = pnand %p1609_p10, %p1605_p1 }
  0x71   : > { %1613 = shalt.err (!%p1610_p13)
}
  0x72   : > { %1310 = dma.hbm_to_vmem [thread:$0]  (!%p1890_p9), %s488_s19, 128, %s490_s11, %s478_s28  }
  0x73   : > { %498 = sbr.rel (%p1837_p8) target bundleno = 1176 (0x498), region = 68  ;;  %s1990_s20 = sand.u32 (!%p1837_p8), 1, %s1707_s22  }
  0x74   : > { %s1993_s13 = sshll.u32 (!%p1837_p8), %s1990_s20, 3  ;;  %s501_s6 = scalar_lea.sflag (!%p1837_p8), [#allocation3], %s1990_s20 }
  0x75   : > { %s504_s1 = scalar_lea.vmem (!%p1837_p8), [#allocation2], %s1993_s13 }
  0x78   : > { %1674 = dma.done.wait (%p1824_p4), %s501_s6, 128  }
  0x79   : > { %1676 = vsyncadd (%p1824_p4), %s501_s6, 4294967168  ;;  %s510_s14 = sand.u32 1, %s1815_s25   ;;  %s514_s8 = scalar_lea.vmem [#allocation5], %s1993_s13 }
  0x7a   : > { %s511_s4 = scalar_lea.sflag [#allocation6], %s510_s14 }
  0x7b   : > { %1678 = dma.done.wait (%p1824_p4), %s511_s4, 256  }
  0x7c   : > { %1680 = vsyncadd (%p1824_p4), %s511_s4, 4294967040  ;;  %s524_s10 = scalar_lea.vmem [#allocation7], %s1993_s13  ;;  %s531_s19 = scalar_lea.sflag [#allocation9], %s510_s14 }
  0x7d   : > { %s534_s18 = scalar_lea.vmem [#allocation8], %s1993_s13 }
  0x7e   : > { %1682 = dma.done.wait (%p1824_p4), %s531_s19, 128  }
  0x7f   : > { %1684 = vsyncadd (%p1824_p4), %s531_s19, 4294967168  ;;  %p2170_p8 = scmp.eq.s32.totalorder %s1815_s25, 0 }
  0x81   : > { %1686 = dma.done.wait (%p2170_p8), [#allocation9], 512   ;;  %p2171_p9 = pmov %p2170_p8 }
  0x82   : > { %p2172_p12 = pmov %p2170_p8 }
  0x83   : > { %1688 = vsyncadd (%p2171_p9), [#allocation9], 4294966784 }
  0x84   : > { %1690 = dma.done.wait (%p2172_p12), [#allocation12], 1024   ;;  %p2173_p0 = pmov %p2170_p8 }
  0x86   : > { %1692 = vsyncadd (%p2173_p0), [#allocation12], 4294966272  ;;  %p2174_p5 = pmov %p2173_p0 }
  0x87   : > { %p2175_p7 = pmov %p2173_p0 }
  0x88   : > { %1694 = dma.done.wait (%p2174_p5), [#allocation15], 512  }
  0x89   : > { %1696 = vsyncadd (%p2175_p7), [#allocation15], 4294966784  ;;  %v650_v0 = vld [vmem:[#allocation11 + $0x18] sm:$0xff]  ;;  %v649_v1 = vld [vmem:[#allocation11 + $0x10] sm:$0xff]  ;;  %vm623_vm0 = vcmask 261120   ;;  %vm709_vm1 = vcmask 64512  }
  0x8a   : > { %v618_v2 = vld [vmem:[#allocation10 + $0x18] sm:$0xff]  ;;  %670 = vmatpush.msra.mxu1 %v650_v0  ;;  %v617_v3 = vld [vmem:[#allocation10 + $0x10] sm:$0xff]  ;;  %v648_v4 = vld [vmem:[#allocation11 + $0x8] sm:$0xff]  ;;  %s1723_s12 = smov 104   ;;  %s1724_s26 = smov 120   ;;  %vm988_vm3 = vcmask 130048  }
  0x8b   : > { %639 = vmatpush.msra.mxu0 %v618_v2  ;;  %v616_v5 = vld [vmem:[#allocation10 + $0x8] sm:$0xff]  ;;  %v647_v6 = vld [vmem:[#allocation11] sm:$0xff]  ;;  %v612_v8 = vld [vmem:[%s514_s8] sm:$0xff]  ;;  %s1725_s30 = smov 112   ;;  %s1726_s15 = smov 16   ;;  %vm990_vm4 = vcmask 195584  }
  0x8c   : > { %671 = vmatpush.msra.mxu1 %v649_v1  ;;  %v615_v7 = vld [vmem:[#allocation10] sm:$0xff]  ;;  %v681_v16 = vld [vmem:[#allocation13 + $0x18] sm:$0xff]  ;;  %v680_v17 = vld [vmem:[#allocation13 + $0x10] sm:$0xff]  ;;  %s1727_s29 = smov 8   ;;  %s1728_s6 = smov 24  }
  0x8d   : > { %640 = vmatpush.msra.mxu0 %v617_v3  ;;  %v611_v9 = vld [vmem:[%s504_s1] sm:$0xff]  ;;  %701 = vmatpush.msra.mxu2 %v681_v16  ;;  %v614_v27 = vld [vmem:[%s534_s18] sm:$0xff]  ;;  %s1256_s1 = sshll.u32 %s1815_s25, 3  ;;  %s2176_s8 = sld [smem:[#allocation35_spill]] }
  0x8e   : > { %672 = vmatpush.msra.mxu1 %v648_v4  ;;  %v1369_v10 = vld [vmem:[%s2123_s7] ss:$0 sm:$0xff]  ;;  %v679_v18 = vld [vmem:[#allocation13 + $0x8] sm:$0xff]  ;;  %vm737_vm2 = vcmp.eq.f32.partialorder %v614_v27, 0.0  ;;  %s2178_s11 = sld [smem:[#allocation34_spill]]  ;;  %s610_s21 = scalar_lea.vmem [#allocation16], %s1993_s13 }
  0x8f   : > { %641 = vmatpush.msra.mxu0 %v616_v5  ;;  %v1370_v11 = vld [vmem:[%s2121_s5] ss:$0 sm:$0xff]  ;;  %702 = vmatpush.msra.mxu2 %v680_v17  ;;  %s1037_s28 = sshll.u32 %s610_s21, 4  ;;  %s1038_s28 = int_to_ptr.vmem [resolvable:$true] %s1037_s28 }
  0x90   : > { %673 = vmatpush.msra.mxu1 %v647_v6  ;;  %v678_v19 = vld [vmem:[#allocation13] sm:$0xff] }
  0x91   : > { %642 = vmatpush.msra.mxu0 %v615_v7  ;;  %1240 = vmatmul.msk.f32.vlgmr.msra.gmra.mxu1 %vm623_vm0, %v612_v8  ;;  %v613_v20 = vld [vmem:[%s524_s10] sm:$0xff] }
  0x92   : > { %1239 = vmatmul.msk.f32.vlgmr.msra.gmra.mxu0 %vm623_vm0, %v611_v9  ;;  %703 = vmatpush.msra.mxu2 %v679_v18  ;;  %v1371_v32 = vld [vmem:[%s2125_s9] ss:$0 sm:$0xff] }
  0x93   : > { %s1035_s19 = scalar_lea.hbm %s2176_s8, %s1256_s1  ;;  %s1649_s13 = scalar_lea.hbm %s2176_s8, 16 }
  0x94   : > { %704 = vmatpush.msra.mxu2 %v678_v19 }
  0x95   : > { %1241 = vmatmul.msk.f32.vlgmr.msra.gmra.mxu2 %vm623_vm0, %v613_v20 }
 0x10e   : > { %v675_v12 = vpop.f32.mrf.mxu1 }
 0x10f   : > { %v644_v13 = vpop.f32.mrf.mxu0  ;;  %v676_v14 = vadd.f32 %v1369_v10, %v675_v12 }
 0x110   : > { %v645_v15 = vadd.f32 %v1370_v11, %v644_v13 }
 0x111   : > { %910 = vrot.lane.b32.xlu2 %v676_v14, %s1723_s12  ;;  %775 = vrot.lane.b32.xlu1 %v676_v14, %s1724_s26 }
 0x112   : > { %843 = vrot.lane.b32.xlu0 %v676_v14, %s1725_s30  ;;  %1242 = vmatpush.xpose.msk.msra.mxu3 %vm709_vm1, %v676_v14 }
 0x115   : > { %1243 = vmatmul.msk.f32.vlgmr.msra.gmra.mxu3 %vm709_vm1, %v645_v15 }
 0x118   : > { %v706_v33 = vpop.f32.mrf.mxu2 }
 0x119   : > { %908 = vrot.lane.b32.xlu2 %v645_v15, %s1723_s12  ;;  %773 = vrot.lane.b32.xlu1 %v645_v15, %s1724_s26  ;;  %v707_v34 = vadd.f32 %v1371_v32, %v706_v33  ;;  %v1372_v32 = vld [vmem:[%s2178_s11] ss:$0 sm:$0xff] }
 0x11a   : > { %841 = vrot.lane.b32.xlu0 %v645_v15, %s1725_s30 }
 0x11b   : > { %768 = vmatpush.msrb.mxu3 %v707_v34 }
 0x16b   : > { %v911_v22 = vpop.permute.xlu2 %910 }
 0x173   : > { %v909_v26 = vpop.permute.xlu2 %908 }
 0x183   : > { %v776_v21 = vpop.permute.xlu1 %775 }
 0x184   : > { %v844_v23 = vpop.permute.xlu0 %843  ;;  %1245 = vmatpush.xpose.msk.msrb.mxu0 %vm709_vm1, %v776_v21 }
 0x185   : > { %1248 = vmatpush.xpose.msk.msrb.mxu2 %vm709_vm1, %v844_v23  ;;  %v994_v23 = vld [vmem:[#allocation14 + $0x10] sm:$0xff] }
 0x188   : > { %1251 = vmatpush.xpose.msk.msra.mxu0 %vm709_vm1, %v911_v22  ;;  %v995_v22 = vld [vmem:[#allocation14 + $0x18] sm:$0xff] }
 0x189   : > { %1015 = vmatpush.msra.mxu2 %v995_v22 }
 0x18b   : > { %v774_v24 = vpop.permute.xlu1 %773  ;;  %1016 = vmatpush.msra.mxu2 %v994_v23 }
 0x18c   : > { %v842_v25 = vpop.permute.xlu0 %841  ;;  %1246 = vmatmul.msk.f32.vlgmr.msrb.gmra.mxu0 %vm709_vm1, %v774_v24  ;;  %v993_v24 = vld [vmem:[#allocation14 + $0x8] sm:$0xff] }
 0x18d   : > { %1249 = vmatmul.msk.f32.vlgmr.msrb.gmra.mxu2 %vm709_vm1, %v842_v25  ;;  %v992_v25 = vld [vmem:[#allocation14] sm:$0xff] }
 0x18e   : > { %1017 = vmatpush.msra.mxu2 %v993_v24 }
 0x190   : > { %1018 = vmatpush.msra.mxu2 %v992_v25 }
 0x194   : > { %1252 = vmatmul.msk.f32.vlgmr.msra.gmra.mxu0 %vm709_vm1, %v909_v26 }
 0x198   : > { %v733_v28 = vpop.f32.mrf.mxu3 }
 0x199   : > { %v736_v29 = vmul.f32 0.35355338, %v733_v28 }
 0x19b   : > { %v738_v30 = vsel %vm737_vm2, -1e+10, %v736_v29 }
 0x19c   : > { %v739_v31 = vsel %vm709_vm1, %v738_v30, -inf }
 0x19d   : > { %740 = vmax.xlane.f32.xlu0 %v739_v31 }
 0x209   : > { %v798_v35 = vpop.f32.mrf.mxu0 }
 0x20a   : > { %v801_v36 = vmul.f32 0.35355338, %v798_v35 }
 0x20c   : > { %v802_v37 = vsel %vm737_vm2, -1e+10, %v801_v36 }
 0x20d   : > { %v803_v38 = vsel %vm709_vm1, %v802_v37, -inf }
 0x20e   : > { %804 = vmax.xlane.f32.xlu1 %v803_v38 }
 0x210   : > { %v866_v39 = vpop.f32.mrf.mxu2  ;;  %v741_v40 = vpop.xlane.xlu0 %740 }
 0x211   : > { %v869_v41 = vmul.f32 0.35355338, %v866_v39  ;;  %v742_v42 = vsub.f32 %v738_v30, %v741_v40  ;;  %v933_v43 = vpop.f32.mrf.mxu0 }
 0x212   : > { %v936_v47 = vmul.f32 0.35355338, %v933_v43 }
 0x213   : > { %v743_v44 = vmul.f32 1.442695, %v742_v42  ;;  %v870_v45 = vsel %vm737_vm2, -1e+10, %v869_v41 }
 0x214   : > { %v871_v46 = vsel %vm709_vm1, %v870_v45, -inf  ;;  %v937_v48 = vsel %vm737_vm2, -1e+10, %v936_v47 }
 0x215   : > { %1373 = vpow2.f32 %v743_v44  ;;  %872 = vmax.xlane.f32.xlu2 %v871_v46  ;;  %v938_v50 = vsel %vm709_vm1, %v937_v48, -inf }
 0x21b   : > { %v1374_v49 = vpop.eup %1373 }
 0x21c   : > { %v745_v51 = vsel %vm709_vm1, %v1374_v49, 0.0 }
 0x21d   : > { %939 = vmax.xlane.f32.xlu2 %v938_v50  ;;  %746 = vadd.xlane.f32.xlu0 %v745_v51 }
 0x281   : > { %v805_v52 = vpop.xlane.xlu1 %804 }
 0x282   : > { %v806_v53 = vsub.f32 %v802_v37, %v805_v52 }
 0x284   : > { %v807_v54 = vmul.f32 1.442695, %v806_v53 }
 0x286   : > { %1375 = vpow2.f32 %v807_v54 }
 0x288   : > { %v873_v55 = vpop.xlane.xlu2 %872 }
 0x289   : > { %v874_v56 = vsub.f32 %v870_v45, %v873_v55 }
 0x28b   : > { %v875_v57 = vmul.f32 1.442695, %v874_v56 }
 0x28c   : > { %v1376_v58 = vpop.eup %1375 }
 0x28d   : > { %1377 = vpow2.f32 %v875_v57  ;;  %v809_v59 = vsel %vm709_vm1, %v1376_v58, 0.0 }
 0x28e   : > { %810 = vadd.xlane.f32.xlu1 %v809_v59 }
 0x290   : > { %v940_v60 = vpop.xlane.xlu2 %939  ;;  %v747_v61 = vpop.xlane.xlu0 %746 }
 0x291   : > { %v941_v62 = vsub.f32 %v937_v48, %v940_v60  ;;  %1379 = vrcp.f32 %v747_v61 }
 0x293   : > { %v1378_v63 = vpop.eup %1377  ;;  %v942_v0 = vmul.f32 1.442695, %v941_v62 }
 0x294   : > { %v877_v1 = vsel %vm709_vm1, %v1378_v63, 0.0 }
 0x295   : > { %1381 = vpow2.f32 %v942_v0  ;;  %878 = vadd.xlane.f32.xlu2 %v877_v1 }
 0x297   : > { %v1380_v2 = vpop.eup %1379 }
 0x298   : > { %v749_v3 = vmul.f32 %v1380_v2, %v1374_v49 }
 0x29a   : > { %1244 = vmatmul.msk.f32.vlgmr.msrb.gmra.mxu3 %vm709_vm1, %v749_v3 }
 0x29b   : > { %v1382_v4 = vpop.eup %1381 }
 0x29c   : > { %v944_v5 = vsel %vm709_vm1, %v1382_v4, 0.0 }
 0x29d   : > { %945 = vadd.xlane.f32.xlu0 %v944_v5 }
 0x2a7   : > { %815 = vrot.lane.b32.xlu1 %v707_v34, %s1724_s26  ;;  %s1025_s26 = scalar_lea.sflag [#allocation4], %s1990_s20 }
 0x2ad   : > { %882 = vrot.lane.b32.xlu2 %v707_v34, %s1725_s30 }
 0x2b1   : > { %949 = vrot.lane.b32.xlu0 %v707_v34, %s1723_s12  ;;  %s1039_s12 = sshll.u32 %s1035_s19, 4  ;;  %s1040_s12 = int_to_ptr.hbm [resolvable:$true] %s1039_s12 }
 0x2b2   : > { %s1643_s25 = sshra.s32 %s1040_s12, 4  ;;  %s1644_s25 = int_to_ptr.hbm [resolvable:$true] %s1643_s25 }
 0x2b3   : > { %s1645_s30 = scalar_lea.hbm %s1644_s25, 8  ;;  %p1650_p2 = scmp.lt.s32.totalorder %s1644_s25, %s2176_s8 }
 0x2b4   : > { %p1646_p4 = scmp.ne.s32.totalorder %s1644_s25, %s1645_s30  ;;  %p1651_p10 = scmp.lt.s32.totalorder %s1649_s13, %s1645_s30 }
 0x2b6   : > { %p1647_p1 = pnand %p1646_p4, %p1874_p3  ;;  %p1652_p13 = por %p1651_p10, %p1650_p2 }
 0x2b8   : > { %p1648_p11 = pneg %p1647_p1 }
 0x2ba   : > { %p1653_p8 = pnand %p1652_p13, %p1648_p11 }
 0x301   : > { %v811_v7 = vpop.xlane.xlu1 %810 }
 0x308   : > { %v879_v6 = vpop.xlane.xlu2 %878 }
 0x309   : > { %1383 = vrcp.f32 %v879_v6 }
 0x30a   : > { %1385 = vrcp.f32 %v811_v7 }
 0x30f   : > { %v1384_v8 = vpop.eup %1383 }
 0x310   : > { %v881_v9 = vmul.f32 %v1384_v8, %v1378_v63  ;;  %v883_v10 = vpop.permute.xlu2 %882  ;;  %v1386_v11 = vpop.eup %1385 }
 0x311   : > { %903 = vmatpush.msra.mxu3 %v883_v10  ;;  %v946_v12 = vpop.xlane.xlu0 %945  ;;  %v813_v14 = vmul.f32 %v1386_v11, %v1376_v58 }
 0x312   : > { %1250 = vmatmul.msk.f32.vlgmr.msra.gmra.mxu3 %vm709_vm1, %v881_v9  ;;  %1387 = vrcp.f32 %v946_v12 }
 0x318   : > { %v1388_v15 = vpop.eup %1387 }
 0x319   : > { %v816_v13 = vpop.permute.xlu1 %815  ;;  %v948_v16 = vmul.f32 %v1388_v15, %v1382_v4 }
 0x31a   : > { %836 = vmatpush.msrb.mxu1 %v816_v13 }
 0x31b   : > { %1247 = vmatmul.msk.f32.vlgmr.msrb.gmra.mxu1 %vm709_vm1, %v813_v14 }
 0x31d   : > { %v770_v18 = vpop.f32.mrf.mxu3 }
 0x323   : > { %v950_v17 = vpop.permute.xlu0 %949 }
 0x324   : > { %970 = vmatpush.msra.mxu1 %v950_v17 }
 0x325   : > { %1253 = vmatmul.msk.f32.vlgmr.msra.gmra.mxu1 %vm709_vm1, %v948_v16 }
 0x395   : > { %v905_v19 = vpop.f32.mrf.mxu3 }
 0x396   : > { %980 = vrot.lane.b32.xlu0 %v905_v19, %s1726_s15 }
 0x398   : > { %v838_v20 = vpop.f32.mrf.mxu1 }
 0x399   : > { %976 = vrot.lane.b32.xlu1 %v838_v20, %s1727_s29 }
 0x3a2   : > { %v972_v21 = vpop.f32.mrf.mxu1 }
 0x3a3   : > { %984 = vrot.lane.b32.xlu2 %v972_v21, %s1728_s6 }
 0x3fd   : > { %v985_v29 = vpop.permute.xlu2 %984 }
 0x408   : > { %v981_v27 = vpop.permute.xlu0 %980 }
 0x40b   : > { %v977_v26 = vpop.permute.xlu1 %976 }
 0x40c   : > { %v987_v28 = vsel %vm709_vm1, %v770_v18, %v977_v26 }
 0x40d   : > { %v989_v30 = vsel %vm988_vm3, %v987_v28, %v981_v27 }
 0x40e   : > { %v991_v31 = vsel %vm990_vm4, %v989_v30, %v985_v29 }
 0x40f   : > { %1254 = vmatmul.msk.f32.vlgmr.msra.gmra.mxu2 %vm623_vm0, %v991_v31 }
 0x492   : > { %v1020_v33 = vpop.f32.mrf.mxu2 }
 0x493   : > { %v1021_v34 = vadd.f32 %v1372_v32, %v1020_v33 }
 0x495   : > { %1023 = vst.msk [vmem:[%s610_s21] sm:$0xff] %vm623_vm0, %v1021_v34 }
 0x496   : > { %1656 = shalt.err (!%p1653_p8)
}
 0x497   : > { %1283 = dma.vmem_to_hbm [thread:$0]  (%p1874_p3), %s1038_s28, 128, %s1040_s12, %s1025_s26  }
 0x498 PF: > { %s2179_s20 = sld [smem:[#allocation24_spill]]  ;;  %p2181_p9 = scmp.ge.s32.totalorder %s1715_s24, 2 }
 0x49a   : > { %p1312_p12 = pnand %p2181_p9, %p1829_p6 }
 0x49c   : > { %p1313_p0 = pneg %p1312_p12 }
 0x49e   : > { %s1051_s1 = sand.u32 1, %s2179_s20  }
 0x49f   : > { %s1052_s14 = scalar_lea.sflag [#allocation4], %s1051_s1 }
 0x4a0   : > { %1698 = dma.done.wait (%p1313_p0), %s1052_s14, 128  }
 0x4a1   : > { %1700 = vsyncadd (%p1313_p0), %s1052_s14, 4294967168  ;;  %s2182_s24 = sld [smem:[#allocation26_spill]]  ;;  %s2184_s21 = smov %s1707_s22 }
 0x4a2   : > { %s2183_s4 = sld [smem:[#allocation28_spill]]  ;;  %s2185_s22 = smov %s1711_s23 }
 0x4a7   : > { %p33_p5 = scmp.ge.s32.totalorder %s2182_s24, 4  }
 0x4a8   : > { %s2186_s23 = smov %s2183_s4 }
 0x4a9   :  { %35 = sbr.rel (!%p33_p5) target bundleno = 19 (0x13), region = 166 }
 0x4ae   :  { %1058 = vsyncpa [#allocation3], 1 }
 0x4af   :  { %1060 = vsyncpa [#allocation3 + $0x1], 1 }
 0x4b0   :  { %1061 = vsyncpa [#allocation6], 1 }
 0x4b1   :  { %1063 = vsyncpa [#allocation6 + $0x1], 1 }
 0x4b2   :  { %1064 = vsyncpa [#allocation9], 1 }
 0x4b3   :  { %1066 = vsyncpa [#allocation9 + $0x1], 1 }
 0x4b4   :  { %1067 = vsyncpa [#allocation12], 1 }
 0x4b5   :  { %1068 = vsyncpa [#allocation15], 1 }
 0x4b6   :  { %1069 = vsyncpa [#allocation4], 1 }
 0x4b7   :  { %1071 = vsyncpa [#allocation4 + $0x1], 1 }

</bundles_post_ra>
